<compile_context>
chip_gen: v7x
topology: tpu7x:2x2x1
jax: 0.10.0
libtpu: 0.0.40
codegen_flags: <defaults>
</compile_context>

<pallas_src>
import jax
import jax.numpy as jnp
from jax.experimental import pallas as pl
from jax.experimental.pallas import tpu as pltpu


def _round_up(n, m):
    return (n + m - 1) // m * m


def _sublane_multiple(dtype):
    # f32 -> 8, bf16 -> 16, int8/fp8 -> 32 rows per packed sublane tile.
    return {4: 8, 2: 16, 1: 32}.get(jnp.dtype(dtype).itemsize, 8)


_SQRT_2_OVER_PI = 0.7978845608028654


def _gelu_tanh(x):
    # tanh-form GELU: one EUP tanh + a handful of VALU ops (vs ~10+ for A&S erf).
    return 0.5 * x * (1.0 + jnp.tanh(_SQRT_2_OVER_PI * (x + 0.044715 * x * x * x)))


def residual2_ffn_kernel(x_ref, xc_ref, w1x_ref, w1c_ref, b1_ref, w2_ref, b2_ref,
                         o_ref, acc_ref):
    h_idx = pl.program_id(1)

    # Linear([x ; x2] -> hidden tile): native-dtype MXU matmuls, f32 accumulation.
    # Weights were pre-transposed once in the wrapper, so this is the standard
    # contraction -- no per-tile weight re-orientation inside the grid.
    h = jnp.dot(x_ref[...], w1x_ref[...], preferred_element_type=jnp.float32)
    h = h + jnp.dot(xc_ref[...], w1c_ref[...], preferred_element_type=jnp.float32)
    h = h + b1_ref[...].astype(jnp.float32)

    # GELU (tanh form) in f32.
    h = _gelu_tanh(h)

    # Linear(hidden tile -> dim), accumulated across hidden tiles in VMEM scratch.
    part = jnp.dot(h.astype(w2_ref.dtype), w2_ref[...],
                   preferred_element_type=jnp.float32)

    @pl.when(h_idx == 0)
    def _():
        acc_ref[...] = part          # first hidden tile: assign (skip zero-init store)

    @pl.when(h_idx > 0)
    def _():
        acc_ref[...] += part

    @pl.when(h_idx == pl.num_programs(1) - 1)
    def _():
        y = acc_ref[...] + b2_ref[...].astype(jnp.float32)
        # Residual2: fn(x, x2) + x  -- residual fused into the finalize step.
        o_ref[...] = (y + x_ref[...].astype(jnp.float32)).astype(o_ref.dtype)


def prepare_residual2_ffn_params(w1x, w1c, b1, w2, b2, *, block_hidden=512,
                                 weight_tile_vmem_budget=32 * 1024 * 1024):
    """One-time parameter prep (pad to lane multiples + transpose); do NOT call per step.

    w1x, w1c : (hidden, dim)  -- PyTorch nn.Linear layout (out, in)
    b1       : (hidden,)
    w2       : (dim, hidden)
    b2       : (dim,)
    """
    hidden, dim = w1x.shape
    dim_p = _round_up(dim, 128)
    hidden_p = _round_up(hidden, 128)

    # Pick bh: largest multiple of 128 that divides hidden_p (no padded FLOPs),
    # is <= block_hidden, and whose double-buffered weight tiles fit the budget
    # (keeps the working set inside v7x's 64 MiB VMEM as well).
    wsz = jnp.dtype(w1x.dtype).itemsize

    def weight_tile_bytes(bh):
        return 2 * (2 * dim_p * bh + bh * dim_p) * wsz   # W1x, W1c, W2 double-buffered

    n128 = hidden_p // 128
    bh = 128
    for d in range(1, n128 + 1):
        if n128 % d:
            continue
        cand = 128 * d
        if cand <= block_hidden and weight_tile_bytes(cand) <= weight_tile_vmem_budget:
            bh = cand

    def pad2(a, r, c):
        return jnp.pad(a, ((0, r - a.shape[0]), (0, c - a.shape[1])))

    w1x_t = pad2(w1x, hidden_p, dim_p).T      # (dim_p, hidden_p)
    w1c_t = pad2(w1c, hidden_p, dim_p).T      # (dim_p, hidden_p)
    w2_t = pad2(w2, dim_p, hidden_p).T        # (hidden_p, dim_p)
    b1_p = jnp.pad(b1, (0, hidden_p - hidden)).reshape(1, hidden_p)
    b2_p = jnp.pad(b2, (0, dim_p - dim)).reshape(1, dim_p)

    return dict(w1x_t=w1x_t, w1c_t=w1c_t, b1=b1_p, w2_t=w2_t, b2=b2_p,
                dim=dim, hidden=hidden, dim_p=dim_p, hidden_p=hidden_p, bh=bh)


def residual2_ffn(x, x2, params, *, block_rows=512):
    """Residual2(fn)(x, x2) = fn(x, x2) + x, with fn = GELU-FFN over [x ; x2]."""
    assert x.shape == x2.shape
    dim = params["dim"]
    dim_p = params["dim_p"]
    hidden_p = params["hidden_p"]
    bh = params["bh"]
    assert x.shape[-1] == dim
    lead = x.shape[:-1]

    x2d = x.reshape(-1, dim)
    xc2d = x2.reshape(-1, dim)
    m = x2d.shape[0]

    # Dtype-aware sublane rounding for row tiles; big tiles amortize per-step overhead
    # and weight streaming; guarantee >= 2 row tiles when possible so both v7x
    # TensorCores get work on the "parallel" axis.
    row_mult = _sublane_multiple(x.dtype)
    m_r = _round_up(m, row_mult)
    bm = min(block_rows, m_r)
    n_row = -(-m_r // bm)
    if n_row == 1 and m_r >= 2 * row_mult:
        n_row = 2
    bm = _round_up(-(-m_r // n_row), row_mult)
    m_pad = bm * n_row
    n_hid = hidden_p // bh

    def pad2(a, r, c):
        return jnp.pad(a, ((0, r - a.shape[0]), (0, c - a.shape[1])))

    x2d = pad2(x2d, m_pad, dim_p)
    xc2d = pad2(xc2d, m_pad, dim_p)

    isz = jnp.dtype(x.dtype).itemsize
    wsz = jnp.dtype(params["w1x_t"].dtype).itemsize

    # VMEM footprint of one grid step (double-buffered inputs/outputs + scratch).
    tile_vmem = (
        2 * 2 * bm * dim_p * isz                 # x, x2 tiles
        + 2 * 2 * dim_p * bh * wsz               # W1x, W1c tiles
        + 2 * bh * dim_p * wsz                   # W2 tile
        + 2 * 8 * bh * 4 + 2 * 8 * dim_p * 4     # b1, b2 (sublane-padded)
        + 2 * bm * dim_p * isz                   # output tile
        + bm * dim_p * 4                         # f32 accumulator
    )
    vmem_limit = min(max(int(tile_vmem * 1.25) + (4 << 20), 32 << 20), 100 << 20)

    flops = 6 * m_pad * dim_p * hidden_p          # 3 matmuls
    transcendentals = m_pad * hidden_p            # one tanh per activation
    bytes_accessed = (
        (x2d.size + xc2d.size + m_pad * dim_p) * isz
        + n_row * (3 * dim_p * hidden_p * wsz)
        + hidden_p * 4 + dim_p * 4)
    cost = pl.CostEstimate(flops=int(flops),
                           transcendentals=int(transcendentals),
                           bytes_accessed=int(bytes_accessed))

    out = pl.pallas_call(
        residual2_ffn_kernel,
        out_shape=jax.ShapeDtypeStruct((m_pad, dim_p), x.dtype),
        grid=(n_row, n_hid),                                   # reduction axis last
        in_specs=[
            pl.BlockSpec((bm, dim_p), lambda i, h: (i, 0)),    # x tile (also residual)
            pl.BlockSpec((bm, dim_p), lambda i, h: (i, 0)),    # x2 tile
            pl.BlockSpec((dim_p, bh), lambda i, h: (0, h)),    # W1x^T tile (streamed)
            pl.BlockSpec((dim_p, bh), lambda i, h: (0, h)),    # W1c^T tile (streamed)
            pl.BlockSpec((1, bh), lambda i, h: (0, h)),        # b1 tile
            pl.BlockSpec((bh, dim_p), lambda i, h: (h, 0)),    # W2^T tile (streamed)
            pl.BlockSpec((1, dim_p), lambda i, h: (0, 0)),     # b2 (grid-invariant)
        ],
        out_specs=pl.BlockSpec((bm, dim_p), lambda i, h: (i, 0)),
        scratch_shapes=[pltpu.VMEM((bm, dim_p), jnp.float32)],  # f32 accumulator
        compiler_params=pltpu.CompilerParams(
            dimension_semantics=("parallel", "arbitrary"),
            vmem_limit_bytes=vmem_limit),
        cost_estimate=cost,
    )(x2d, xc2d, params["w1x_t"], params["w1c_t"], params["b1"],
      params["w2_t"], params["b2"])

    return out[:m, :dim].reshape(*lead, dim)


if __name__ == "__main__":
    # Small shapes consistent with the module: x, x2 of shape (batch, seq, dim).
    batch, seq, dim, hidden = 2, 16, 128, 256

    key = jax.random.PRNGKey(0)
    kx, kx2, kw1x, kw1c, kb1, kw2, kb2 = jax.random.split(key, 7)

    def bf16_repr(a):
        # Round test values to bf16-representable f32 so the comparison is
        # insensitive to any MXU-side bf16 input rounding in either path.
        return a.astype(jnp.bfloat16).astype(jnp.float32)

    x = bf16_repr(jax.random.normal(kx, (batch, seq, dim), dtype=jnp.float32))
    x2 = bf16_repr(jax.random.normal(kx2, (batch, seq, dim), dtype=jnp.float32))
    # PyTorch Linear stores weight as (out_features, in_features).
    w1x = bf16_repr(jax.random.normal(kw1x, (hidden, dim), jnp.float32) * dim ** -0.5)
    w1c = bf16_repr(jax.random.normal(kw1c, (hidden, dim), jnp.float32) * dim ** -0.5)
    b1 = bf16_repr(jax.random.normal(kb1, (hidden,), jnp.float32) * 0.01)
    w2 = bf16_repr(jax.random.normal(kw2, (dim, hidden), jnp.float32) * hidden ** -0.5)
    b2 = bf16_repr(jax.random.normal(kb2, (dim,), jnp.float32) * 0.01)

    params = prepare_residual2_ffn_params(w1x, w1c, b1, w2, b2)
    out = residual2_ffn(x, x2, params)
    out = jax.block_until_ready(out)

    # Pure-JAX reference: Residual2(fn)(x, x2) = fn(x, x2) + x, with the same
    # tanh-form GELU and full-precision matmuls.
    pH = jax.lax.Precision.HIGHEST
    h_ref = jax.nn.gelu(
        jnp.matmul(x, w1x.T, precision=pH)
        + jnp.matmul(x2, w1c.T, precision=pH) + b1,
        approximate=True)
    ref = jnp.matmul(h_ref, w2.T, precision=pH) + b2 + x

    assert out.shape == ref.shape == (batch, seq, dim)
    err = float(jnp.max(jnp.abs(out - ref)))
    assert err < 5e-4, err

    print("KERNEL_OK")
</pallas_src>

<mosaic_0001>
module attributes {stable_mosaic.version = 11 : i64} {
  func.func @residual2_ffn_kernel(%arg0: i32, %arg1: i32, %arg2: memref<16x128xf32, #tpu.memory_space<vmem>>, %arg3: memref<16x128xf32, #tpu.memory_space<vmem>>, %arg4: memref<128x256xf32, #tpu.memory_space<vmem>>, %arg5: memref<128x256xf32, #tpu.memory_space<vmem>>, %arg6: memref<1x256xf32, #tpu.memory_space<vmem>>, %arg7: memref<256x128xf32, #tpu.memory_space<vmem>>, %arg8: memref<1x128xf32, #tpu.memory_space<vmem>>, %arg9: memref<16x128xf32, #tpu.memory_space<vmem>>, %arg10: memref<16x128xf32, #tpu.memory_space<vmem>>) attributes {dimension_semantics = [#tpu.dimension_semantics<parallel>, #tpu.dimension_semantics<arbitrary>], iteration_bounds = array<i64: 2, 1>, scalar_prefetch = 0 : i64, scratch_operands = 1 : i64, tpu.core_type = #tpu.core_type<tc>, window_params = [{transform_indices = @transform_0, window_bounds = array<i64: 16, 128>}, {transform_indices = @transform_1, window_bounds = array<i64: 16, 128>}, {transform_indices = @transform_2, window_bounds = array<i64: 128, 256>}, {transform_indices = @transform_3, window_bounds = array<i64: 128, 256>}, {transform_indices = @transform_4, window_bounds = array<i64: 1, 256>}, {transform_indices = @transform_5, window_bounds = array<i64: 256, 128>}, {pipeline_mode = #tpu.pipeline_mode<synchronous>, transform_indices = @transform_6, window_bounds = array<i64: 1, 128>}, {transform_indices = @transform_7, window_bounds = array<i64: 16, 128>}]} {
    %c0 = arith.constant 0 : index
    %c0_0 = arith.constant 0 : index
    %0 = vector.load %arg2[%c0, %c0_0] : memref<16x128xf32, #tpu.memory_space<vmem>>, vector<16x128xf32>
    %c0_1 = arith.constant 0 : index
    %c0_2 = arith.constant 0 : index
    %1 = vector.load %arg4[%c0_1, %c0_2] : memref<128x256xf32, #tpu.memory_space<vmem>>, vector<128x256xf32>
    %cst = arith.constant dense<0.000000e+00> : vector<16x256xf32>
    %2 = tpu.matmul %0, %1, %cst {dimension_numbers = #tpu.dot_dimension_numbers<[1], [0], [0], [1], [0, 0, 1, 1], [], []>} : vector<16x128xf32>, vector<128x256xf32>, vector<16x256xf32> -> vector<16x256xf32>
    %c0_3 = arith.constant 0 : index
    %c0_4 = arith.constant 0 : index
    %3 = vector.load %arg3[%c0_3, %c0_4] : memref<16x128xf32, #tpu.memory_space<vmem>>, vector<16x128xf32>
    %c0_5 = arith.constant 0 : index
    %c0_6 = arith.constant 0 : index
    %4 = vector.load %arg5[%c0_5, %c0_6] : memref<128x256xf32, #tpu.memory_space<vmem>>, vector<128x256xf32>
    %cst_7 = arith.constant dense<0.000000e+00> : vector<16x256xf32>
    %5 = tpu.matmul %3, %4, %cst_7 {dimension_numbers = #tpu.dot_dimension_numbers<[1], [0], [0], [1], [0, 0, 1, 1], [], []>} : vector<16x128xf32>, vector<128x256xf32>, vector<16x256xf32> -> vector<16x256xf32>
    %6 = arith.addf %2, %5 : vector<16x256xf32>
    %c0_8 = arith.constant 0 : index
    %c0_9 = arith.constant 0 : index
    %7 = vector.load %arg6[%c0_8, %c0_9] : memref<1x256xf32, #tpu.memory_space<vmem>>, vector<1x256xf32>
    %8 = vector.broadcast %7 : vector<1x256xf32> to vector<16x256xf32>
    %9 = arith.addf %6, %8 : vector<16x256xf32>
    %cst_10 = arith.constant 5.000000e-01 : f32
    %10 = vector.broadcast %cst_10 : f32 to vector<16x256xf32>
    %11 = arith.mulf %10, %9 : vector<16x256xf32>
    %cst_11 = arith.constant 4.471500e-02 : f32
    %12 = vector.broadcast %cst_11 : f32 to vector<16x256xf32>
    %13 = arith.mulf %12, %9 : vector<16x256xf32>
    %14 = arith.mulf %13, %9 : vector<16x256xf32>
    %15 = arith.mulf %14, %9 : vector<16x256xf32>
    %16 = arith.addf %9, %15 : vector<16x256xf32>
    %cst_12 = arith.constant 0.797884583 : f32
    %17 = vector.broadcast %cst_12 : f32 to vector<16x256xf32>
    %18 = arith.mulf %17, %16 : vector<16x256xf32>
    %19 = math.tanh %18 : vector<16x256xf32>
    %cst_13 = arith.constant 1.000000e+00 : f32
    %20 = vector.broadcast %cst_13 : f32 to vector<16x256xf32>
    %21 = arith.addf %20, %19 : vector<16x256xf32>
    %22 = arith.mulf %11, %21 : vector<16x256xf32>
    %c0_14 = arith.constant 0 : index
    %c0_15 = arith.constant 0 : index
    %23 = vector.load %arg7[%c0_14, %c0_15] : memref<256x128xf32, #tpu.memory_space<vmem>>, vector<256x128xf32>
    %cst_16 = arith.constant dense<0.000000e+00> : vector<16x128xf32>
    %24 = tpu.matmul %22, %23, %cst_16 {dimension_numbers = #tpu.dot_dimension_numbers<[1], [0], [0], [1], [0, 0, 1, 1], [], []>} : vector<16x256xf32>, vector<256x128xf32>, vector<16x128xf32> -> vector<16x128xf32>
    %c0_i32 = arith.constant 0 : i32
    %25 = arith.cmpi eq, %arg1, %c0_i32 : i32
    %26 = arith.extui %25 : i1 to i32
    %c0_i32_17 = arith.constant 0 : i32
    %27 = arith.cmpi ne, %26, %c0_i32_17 : i32
    scf.if %27 {
      %c0_22 = arith.constant 0 : index
      %c0_23 = arith.constant 0 : index
      %34 = vector.load %arg10[%c0_22, %c0_23] : memref<16x128xf32, #tpu.memory_space<vmem>>, vector<16x128xf32>
      tpu.vector_store %arg10[%c0_22, %c0_23], %24 {strides = array<i32>} : memref<16x128xf32, #tpu.memory_space<vmem>>, vector<16x128xf32>,
    } else {
    }
    %c0_i32_18 = arith.constant 0 : i32
    %28 = arith.cmpi sgt, %arg1, %c0_i32_18 : i32
    %29 = arith.extui %28 : i1 to i32
    %c0_i32_19 = arith.constant 0 : i32
    %30 = arith.cmpi ne, %29, %c0_i32_19 : i32
    scf.if %30 {
      %c0_22 = arith.constant 0 : index
      %c0_23 = arith.constant 0 : index
      %34 = vector.load %arg10[%c0_22, %c0_23] : memref<16x128xf32, #tpu.memory_space<vmem>>, vector<16x128xf32>
      %35 = arith.addf %34, %24 : vector<16x128xf32>
      %c0_24 = arith.constant 0 : index
      %c0_25 = arith.constant 0 : index
      %36 = vector.load %arg10[%c0_24, %c0_25] : memref<16x128xf32, #tpu.memory_space<vmem>>, vector<16x128xf32>
      tpu.vector_store %arg10[%c0_24, %c0_25], %35 {strides = array<i32>} : memref<16x128xf32, #tpu.memory_space<vmem>>, vector<16x128xf32>,
    } else {
    }
    %c0_i32_20 = arith.constant 0 : i32
    %31 = arith.cmpi eq, %arg1, %c0_i32_20 : i32
    %32 = arith.extui %31 : i1 to i32
    %c0_i32_21 = arith.constant 0 : i32
    %33 = arith.cmpi ne, %32, %c0_i32_21 : i32
    scf.if %33 {
      %c0_22 = arith.constant 0 : index
      %c0_23 = arith.constant 0 : index
      %34 = vector.load %arg10[%c0_22, %c0_23] : memref<16x128xf32, #tpu.memory_space<vmem>>, vector<16x128xf32>
      %c0_24 = arith.constant 0 : index
      %c0_25 = arith.constant 0 : index
      %35 = vector.load %arg8[%c0_24, %c0_25] : memref<1x128xf32, #tpu.memory_space<vmem>>, vector<1x128xf32>
      %36 = vector.broadcast %35 : vector<1x128xf32> to vector<16x128xf32>
      %37 = arith.addf %34, %36 : vector<16x128xf32>
      %c0_26 = arith.constant 0 : index
      %c0_27 = arith.constant 0 : index
      %38 = vector.load %arg2[%c0_26, %c0_27] : memref<16x128xf32, #tpu.memory_space<vmem>>, vector<16x128xf32>
      %39 = arith.addf %37, %38 : vector<16x128xf32>
      %c0_28 = arith.constant 0 : index
      %c0_29 = arith.constant 0 : index
      %40 = vector.load %arg9[%c0_28, %c0_29] : memref<16x128xf32, #tpu.memory_space<vmem>>, vector<16x128xf32>
      tpu.vector_store %arg9[%c0_28, %c0_29], %39 {strides = array<i32>} : memref<16x128xf32, #tpu.memory_space<vmem>>, vector<16x128xf32>,
    } else {
    }
    return
  }
  func.func @transform_0(%arg0: i32, %arg1: i32) -> (i32, i32) {
    %c0_i32 = arith.constant 0 : i32
    %c0_i32_0 = arith.constant 0 : i32
    return %arg0, %c0_i32 : i32, i32
  }
  func.func @transform_1(%arg0: i32, %arg1: i32) -> (i32, i32) {
    %c0_i32 = arith.constant 0 : i32
    %c0_i32_0 = arith.constant 0 : i32
    return %arg0, %c0_i32 : i32, i32
  }
  func.func @transform_2(%arg0: i32, %arg1: i32) -> (i32, i32) {
    %c0_i32 = arith.constant 0 : i32
    %c0_i32_0 = arith.constant 0 : i32
    return %c0_i32, %arg1 : i32, i32
  }
  func.func @transform_3(%arg0: i32, %arg1: i32) -> (i32, i32) {
    %c0_i32 = arith.constant 0 : i32
    %c0_i32_0 = arith.constant 0 : i32
    return %c0_i32, %arg1 : i32, i32
  }
  func.func @transform_4(%arg0: i32, %arg1: i32) -> (i32, i32) {
    %c0_i32 = arith.constant 0 : i32
    %c0_i32_0 = arith.constant 0 : i32
    return %c0_i32, %arg1 : i32, i32
  }
  func.func @transform_5(%arg0: i32, %arg1: i32) -> (i32, i32) {
    %c0_i32 = arith.constant 0 : i32
    %c0_i32_0 = arith.constant 0 : i32
    return %arg1, %c0_i32 : i32, i32
  }
  func.func @transform_6(%arg0: i32, %arg1: i32) -> (i32, i32) {
    %c0_i32 = arith.constant 0 : i32
    %c0_i32_0 = arith.constant 0 : i32
    %c0_i32_1 = arith.constant 0 : i32
    return %c0_i32, %c0_i32_0 : i32, i32
  }
  func.func @transform_7(%arg0: i32, %arg1: i32) -> (i32, i32) {
    %c0_i32 = arith.constant 0 : i32
    %c0_i32_0 = arith.constant 0 : i32
    return %arg0, %c0_i32 : i32, i32
  }
}

</mosaic_0001>

<bundles_post_ra>
// kernel: tpu_custom_call.1
= control target key start
LH: loop header
LB: loop body
LE: loop exit
PB: predicated region body
PF: predicated region fallthrough
CT: control target
= control target key end

     0   :  { %s1954_s0 = inlined_call_operand.hbm [shape: f32[32,128], index: 0, kind: input, shape index: {}]   ;;  %s1955_s1 = inlined_call_operand.hbm [shape: f32[32,128], index: 1, kind: input, shape index: {}]   ;;  %s1956_s2 = inlined_call_operand.hbm [shape: f32[128,256], index: 2, kind: input, shape index: {}]   ;;  %s1957_s3 = inlined_call_operand.hbm [shape: f32[128,256], index: 3, kind: input, shape index: {}]   ;;  %s1958_s4 = inlined_call_operand.vmem [shape: f32[1,256], index: 4, kind: input, shape index: {}]   ;;  %s1959_s5 = inlined_call_operand.hbm [shape: f32[256,128], index: 5, kind: input, shape index: {}]   ;;  %s1960_s6 = inlined_call_operand.vmem [shape: f32[1,128], index: 6, kind: input, shape index: {}]   ;;  %s1961_s7 = inlined_call_operand.hbm [shape: f32[32,128], index: 7, kind: output, shape index: {}]  }
   0x1   :  { %1972 = sst [smem:[#allocation20_spill]] %s1954_s0 }
   0x2   :  { %1973 = sst [smem:[#allocation21_spill]] %s1956_s2 }
   0x3   :  { %1974 = sst [smem:[#allocation22_spill]] %s1957_s3 }
   0x4   :  { %1975 = sst [smem:[#allocation23_spill]] %s1961_s7 }
   0x5   :  { %12 = vsyncpa [#allocation4], 0 }
   0x6   :  { %14 = vsyncpa [#allocation4 + $0x1], 0 }
   0x7   :  { %15 = vsyncpa [#allocation7], 0 }
   0x8   :  { %17 = vsyncpa [#allocation7 + $0x1], 0 }
   0x9   :  { %18 = vsyncpa [#allocation10], 0 }
   0xa   :  { %19 = vsyncpa [#allocation5], 0 }
   0xb   :  { %21 = vsyncpa [#allocation5 + $0x1], 0  ;;  %s1596_s24 = smov 0   ;;  %s1598_s25 = smov 0  }
   0xc   :  { %s1600_s26 = smov 0   ;;  %s1602_s27 = smov 0  }
   0xd   :  { %s1604_s28 = smov 0   ;;  %s1606_s29 = smov 0  }
   0xe LB: > { %1976 = sst [smem:[#allocation18_spill]] %s1521_s24  ;;  %s1627_s30 = sadd.s32 4294967295, %s1541_s29   ;;  %s1541_s29 = sphi %s1606_s29, %s27_s29   ;;  %s1537_s28 = sphi %s1604_s28, %s2007_s28   ;;  %s1533_s27 = sphi %s1602_s27, %s2006_s27   ;;  %s1529_s26 = sphi %s1600_s26, %s2005_s26   ;;  %s1525_s25 = sphi %s1598_s25, %s2004_s25   ;;  %s1521_s24 = sphi %s1596_s24, %s2003_s24  }
   0xf   : > { %s1023_s8 = sadd.s32 4294967294, %s1541_s29   ;;  %p59_p0 = scmp.ne.s32.totalorder %s1525_s25, %s1521_s24 }
  0x10   : > { %p1962_p1 = scmp.eq.s32.totalorder %s1627_s30, 0  ;;  %p240_p3 = scmp.eq.s32.totalorder %s1023_s8, 1 }
  0x11   : > { %p1024_p5 = scmp.ge.s32.totalorder %s1541_s29, 1  ;;  %p247_p7 = scmp.lt.s32.totalorder %s1541_s29, 3 }
  0x12   : > { %p1636_p4 = por %p1962_p1, %p59_p0  ;;  %p1641_p6 = por %p240_p3, %p59_p0 }
  0x13   : > { %p1646_p8 = pnand %p1024_p5, %p247_p7  ;;  %s1543_s12 = smov [#allocation8]  }
  0x14   : > { %s1977_s9 = scalar_select %p1636_p4, 1, 0 }
  0x15   : > { %s1978_s10 = scalar_select %p1641_p6, 1, 0 }
  0x16   : > { %s1980_s11 = scalar_select %p1646_p8, 1, 0 }
  0x17   : > { %1979 = sst [smem:[#allocation19_spill]] %s1978_s10  ;;  %s262_s13 = sshll.u32 %s1543_s12, 4  ;;  %s1650_s13 = int_to_ptr.vmem [resolvable:$true] %s262_s13 }
  0x18   : > { %p1208_p9 = pneg %p1646_p8  ;;  %s1544_s15 = smov [#allocation9]  }
  0x19   : > { %s278_s16 = sshll.u32 %s1544_s15, 4  ;;  %s1545_s17 = smov [#allocation11]   ;;  %s1661_s16 = int_to_ptr.vmem [resolvable:$true] %s278_s16 }
  0x1a   : > { %p1657_p11 = pnand %p1208_p9, %p1962_p1  ;;  %s1663_s18 = sshll.u32 %s1545_s17, 4  ;;  %s303_s18 = int_to_ptr.vmem [resolvable:$true] %s1663_s18 }
  0x1b   : > { %s1982_s2 = sld [smem:[#allocation21_spill]] }
  0x1c   : > { %p1673_p13 = pneg %p1657_p11 }
  0x21   : > { %s1303_s21 = scalar_lea.hbm %s1982_s2, 4096 }
  0x22   : > { %p1304_p12 = scmp.ne.s32.totalorder %s1982_s2, %s1303_s21  ;;  %p1310_p5 = scmp.lt.u32.totalorder %s1303_s21, %s1982_s2 }
  0x24   : > { %p1306_p0 = pnand %p1673_p13, %p1304_p12 }
  0x26   : > { %p1307_p3 = pneg %p1306_p0 }
  0x28   : > { %p1312_p7 = pnand %p1310_p5, %p1307_p3 }
  0x2a   : > { %1315 = shalt.err (!%p1312_p7)
}
  0x2b   : > { %s1316_s17 = scalar_lea.vmem %s1650_s13, 4096  ;;  %p1324_p2 = scmp.lt.s32.totalorder %s1650_s13, %s1650_s13 }
  0x2c   : > { %p1317_p9 = scmp.ne.s32.totalorder %s1650_s13, %s1316_s17  ;;  %p1325_p6 = scmp.lt.s32.totalorder %s1316_s17, %s1316_s17 }
  0x2e   : > { %p1319_p10 = pnand %p1317_p9, %p1673_p13  ;;  %p1326_p12 = por %p1325_p6, %p1324_p2 }
  0x30   : > { %p1320_p1 = pneg %p1319_p10 }
  0x32   : > { %p1327_p0 = pnand %p1326_p12, %p1320_p1 }
  0x34   : > { %1330 = shalt.err (!%p1327_p0)
}
  0x35   : > { %s1546_s19 = smov 256   ;;  %s1547_s20 = smov 16  }
  0x36   : > { %1211 = dma.hbm_to_vmem [thread:$0]  (!%p1657_p11), %s1982_s2, 4096, %s1650_s13, [#allocation7], %s1546_s19, %s1546_s19, %s1547_s20  }
  0x37   : > { %s1984_s3 = sld [smem:[#allocation22_spill]] }
  0x3d   : > { %s1331_s15 = scalar_lea.hbm %s1984_s3, 4096 }
  0x3e   : > { %p1332_p2 = scmp.ne.s32.totalorder %s1984_s3, %s1331_s15  ;;  %p1338_p10 = scmp.lt.u32.totalorder %s1331_s15, %s1984_s3 }
  0x40   : > { %p1334_p1 = pnand %p1332_p2, %p1673_p13 }
  0x42   : > { %p1335_p6 = pneg %p1334_p1 }
  0x44   : > { %p1340_p3 = pnand %p1338_p10, %p1335_p6 }
  0x46   : > { %1343 = shalt.err (!%p1340_p3)
}
  0x47   : > { %s1344_s13 = scalar_lea.vmem %s1661_s16, 4096  ;;  %p1352_p12 = scmp.lt.s32.totalorder %s1661_s16, %s1661_s16 }
  0x48   : > { %p1345_p5 = scmp.ne.s32.totalorder %s1661_s16, %s1344_s13  ;;  %p1353_p0 = scmp.lt.s32.totalorder %s1344_s13, %s1344_s13 }
  0x4a   : > { %p1347_p7 = pnand %p1345_p5, %p1673_p13  ;;  %p1354_p2 = por %p1353_p0, %p1352_p12 }
  0x4c   : > { %p1348_p9 = pneg %p1347_p7 }
  0x4e   : > { %p1355_p1 = pnand %p1354_p2, %p1348_p9 }
  0x50   : > { %1358 = shalt.err (!%p1355_p1)
}
  0x51   : > { %1214 = dma.hbm_to_vmem [thread:$0]  (!%p1657_p11), %s1984_s3, 4096, %s1661_s16, [#allocation10], %s1546_s19, %s1546_s19, %s1547_s20  }
  0x52   : > { %s1359_s22 = scalar_lea.hbm %s1959_s5, 4096 }
  0x53   : > { %p1360_p6 = scmp.ne.s32.totalorder %s1959_s5, %s1359_s22  ;;  %p1366_p5 = scmp.lt.u32.totalorder %s1359_s22, %s1959_s5 }
  0x55   : > { %p1362_p10 = pnand %p1360_p6, %p1673_p13 }
  0x57   : > { %p1363_p3 = pneg %p1362_p10 }
  0x59   : > { %p1368_p7 = pnand %p1366_p5, %p1363_p3 }
  0x5b   : > { %1371 = shalt.err (!%p1368_p7)
}
  0x5c   : > { %s1372_s13 = scalar_lea.vmem %s303_s18, 4096  ;;  %p1380_p2 = scmp.lt.s32.totalorder %s303_s18, %s303_s18 }
  0x5d   : > { %p1373_p9 = scmp.ne.s32.totalorder %s303_s18, %s1372_s13  ;;  %p1381_p1 = scmp.lt.s32.totalorder %s1372_s13, %s1372_s13 }
  0x5f   : > { %p1375_p12 = pnand %p1373_p9, %p1673_p13  ;;  %p1382_p4 = por %p1381_p1, %p1380_p2 }
  0x61   : > { %p1376_p0 = pneg %p1375_p12 }
  0x63   : > { %p1383_p8 = pnand %p1382_p4, %p1376_p0 }
  0x65   : > { %1386 = shalt.err (!%p1383_p8)
}
  0x66   : > { %s1968_s16 = smov 128   ;;  %s1970_s8 = smov 8  }
  0x67   : > { %1217 = dma.hbm_to_vmem [thread:$0]  (!%p1657_p11), %s1959_s5, 4096, %s303_s18, [#allocation10], %s1968_s16, %s1968_s16, %s1970_s8  }
  0x68   : > { %s46_s7 = sadd.s32 1, %s1529_s26  ;;  %s39_s24 = sadd.s32 1, %s1537_s28 }
  0x69   : > { %p53_p4 = scmp.ne.s32.totalorder %s1529_s26, %s1525_s25  ;;  %p41_p8 = scmp.ge.s32.totalorder %s39_s24, 2 }
  0x6a   : > { %p54_p13 = scmp.eq.s32.totalorder %s1541_s29, 0  ;;  %p1985_p6 = scmp.eq.s32.totalorder %s1627_s30, 1 }
  0x6b   : > { %p1232_p3 = scmp.lt.s32.totalorder %s1541_s29, 2  ;;  %s2009_s24 = smov (%p41_p8, %s39_s24), 0 }
  0x6c   : > { %p1746_p10 = por %p1985_p6, %p53_p4  ;;  %p55_p5 = por %p54_p13, %p53_p4 }
  0x6d   : > { %s319_s14 = sand.u32 1, %s1529_s26   ;;  %s43_s21 = ssub.s32 %s1537_s28, %s2009_s24 }
  0x6e   : > { %p44_p7 = scmp.eq.s32.totalorder %s43_s21, 0  ;;  %s1030_s18 = sshll.u32 %s319_s14, 4 }
  0x6f   : > { %s1049_s22 = sshll.u32 %s1537_s28, 8  ;;  %s1987_s0 = sld [smem:[#allocation20_spill]] }
  0x70   : > { %s1758_s23 = scalar_select %p44_p7, %s1529_s26, %s46_s7  }
  0x71   : > { %s323_s13 = scalar_lea.vmem [#allocation3], %s1030_s18  ;;  %p1769_p11 = pnand %p1232_p3, %p55_p5 }
  0x72   : > { %s330_s19 = sshll.u32 %s323_s13, 4  ;;  %s1776_s12 = scalar_lea.hbm %s1955_s1, %s1049_s22  ;;  %s1765_s19 = int_to_ptr.vmem [resolvable:$true] %s330_s19 }
  0x73   : > { %s344_s15 = scalar_lea.vmem [#allocation6], %s1030_s18  ;;  %s1780_s8 = scalar_lea.sflag [#allocation4], %s319_s14 }
  0x74   : > { %s1778_s16 = sshll.u32 %s344_s15, 4  ;;  %p1389_p12 = pneg %p1769_p11  ;;  %s1812_s16 = int_to_ptr.vmem [resolvable:$true] %s1778_s16 }
  0x75   : > { %s1763_s17 = scalar_lea.hbm %s1987_s0, %s1049_s22  ;;  %s1392_s7 = scalar_lea.hbm %s1987_s0, 512 }
  0x76   : > { %s1387_s13 = scalar_lea.hbm %s1763_s17, 256  ;;  %p1393_p1 = scmp.lt.u32.totalorder %s1763_s17, %s1987_s0 }
  0x77   : > { %p1388_p9 = scmp.ne.s32.totalorder %s1763_s17, %s1387_s13  ;;  %p1394_p4 = scmp.lt.u32.totalorder %s1392_s7, %s1387_s13 }
  0x78   : > { %p1396_p13 = scmp.lt.u32.totalorder %s1387_s13, %s1763_s17 }
  0x79   : > { %p1390_p0 = pnand %p1389_p12, %p1388_p9  ;;  %p1395_p8 = por %p1394_p4, %p1393_p1 }
  0x7b   : > { %p1391_p2 = pneg %p1390_p0  ;;  %p1397_p6 = por %p1396_p13, %p1395_p8 }
  0x7d   : > { %p1398_p3 = pnand %p1397_p6, %p1391_p2 }
  0x7f   : > { %1401 = shalt.err (!%p1398_p3)
}
  0x80   : > { %s1402_s14 = scalar_lea.vmem %s1765_s19, 256  ;;  %s1550_s2 = smov [#allocation3]  }
  0x81   : > { %p1403_p5 = scmp.ne.s32.totalorder %s1765_s19, %s1402_s14  ;;  %s1407_s3 = sshll.u32 %s1550_s2, 4  ;;  %s1408_s3 = int_to_ptr.vmem [resolvable:$false] %s1407_s3 }
  0x82   : > { %s1409_s18 = scalar_lea.vmem %s1408_s3, 512  ;;  %p1410_p0 = scmp.lt.s32.totalorder %s1765_s19, %s1408_s3 }
  0x83   : > { %p1405_p7 = pnand %p1403_p5, %p1389_p12  ;;  %p1411_p1 = scmp.lt.s32.totalorder %s1409_s18, %s1402_s14 }
  0x85   : > { %p1406_p9 = pneg %p1405_p7  ;;  %p1412_p4 = por %p1411_p1, %p1410_p0 }
  0x87   : > { %p1413_p8 = pnand %p1412_p4, %p1406_p9 }
  0x89   : > { %1416 = shalt.err (!%p1413_p8)
}
  0x8a   : > { %s1989_s15 = smov 8   ;;  %s1990_s13 = smov 128  }
  0x8b   : > { %1221 = dma.hbm_to_vmem [thread:$0]  (!%p1769_p11), %s1763_s17, 256, %s1765_s19, %s1780_s8, %s1990_s13, %s1990_s13, %s1989_s15  }
  0x8c   : > { %s340_s7 = sand.u32 1, %s1541_s29   ;;  %s1417_s22 = scalar_lea.hbm %s1776_s12, 256 }
  0x8d   : > { %s1815_s21 = scalar_lea.sflag [#allocation7], %s340_s7  ;;  %p1418_p2 = scmp.ne.s32.totalorder %s1776_s12, %s1417_s22 }
  0x8e   : > { %s1422_s3 = scalar_lea.hbm %s1955_s1, 512  ;;  %p1423_p3 = scmp.lt.u32.totalorder %s1776_s12, %s1955_s1 }
  0x8f   : > { %p1420_p13 = pnand %p1418_p2, %p1389_p12  ;;  %p1424_p5 = scmp.lt.u32.totalorder %s1422_s3, %s1417_s22 }
  0x90   : > { %p1426_p9 = scmp.lt.u32.totalorder %s1417_s22, %s1776_s12 }
  0x91   : > { %p1421_p6 = pneg %p1420_p13  ;;  %p1425_p7 = por %p1424_p5, %p1423_p3 }
  0x93   : > { %p1427_p0 = por %p1426_p9, %p1425_p7 }
  0x95   : > { %p1428_p1 = pnand %p1427_p0, %p1421_p6 }
  0x97   : > { %1431 = shalt.err (!%p1428_p1)
}
  0x98   : > { %s1432_s8 = scalar_lea.vmem %s1812_s16, 256  ;;  %s1551_s17 = smov [#allocation6]  }
  0x99   : > { %p1433_p4 = scmp.ne.s32.totalorder %s1812_s16, %s1432_s8  ;;  %s1437_s19 = sshll.u32 %s1551_s17, 4  ;;  %s1438_s19 = int_to_ptr.vmem [resolvable:$false] %s1437_s19 }
  0x9a   : > { %s1439_s0 = scalar_lea.vmem %s1438_s19, 512  ;;  %p1440_p13 = scmp.lt.s32.totalorder %s1812_s16, %s1438_s19 }
  0x9b   : > { %p1435_p8 = pnand %p1433_p4, %p1389_p12  ;;  %p1441_p3 = scmp.lt.s32.totalorder %s1439_s0, %s1432_s8 }
  0x9d   : > { %p1436_p2 = pneg %p1435_p8  ;;  %p1442_p5 = por %p1441_p3, %p1440_p13 }
  0x9f   : > { %p1443_p7 = pnand %p1442_p5, %p1436_p2 }
  0xa1   : > { %1446 = shalt.err (!%p1443_p7)
}
  0xa2   : > { %1224 = dma.hbm_to_vmem [thread:$0]  (!%p1769_p11), %s1776_s12, 256, %s1812_s16, %s1815_s21, %s1990_s13, %s1990_s13, %s1989_s15  }
  0xa3   : > { %p1991_p12 = scmp.ne.s32.totalorder %s1980_s11, 0 }
  0xa4   : > { %s1847_s7 = sand.u32 (!%p1991_p12), 1, %s1525_s25   ;;  %p1992_p6 = scmp.ne.s32.totalorder (!%p1991_p12), %s1977_s9, 0 }
  0xa5   : > { %363 = sbr.rel (%p1991_p12) target bundleno = 729 (0x2d9), region = 48  ;;  %s1850_s22 = sshll.u32 (!%p1991_p12), %s1847_s7, 4 }
  0xa6   : > { %s366_s20 = scalar_lea.sflag (!%p1991_p12), [#allocation4], %s1847_s7  ;;  %s369_s14 = scalar_lea.vmem (!%p1991_p12), [#allocation3], %s1850_s22 }
  0xac   : > { %1500 = dma.done.wait (%p1992_p6), %s366_s20, 256  }
  0xad   : > { %1502 = vsyncadd (%p1992_p6), %s366_s20, 4294967040  ;;  %s374_s11 = sand.u32 1, %s1627_s30   ;;  %s378_s12 = scalar_lea.vmem [#allocation6], %s1850_s22 }
  0xae   : > { %s375_s16 = scalar_lea.sflag [#allocation7], %s374_s11 }
  0xaf   : > { %1504 = dma.done.wait (%p1992_p6), %s375_s16, 256  }
  0xb0   : > { %1506 = vsyncadd (%p1992_p6), %s375_s16, 4294967040  ;;  %p1993_p11 = scmp.eq.s32.totalorder %s1627_s30, 0 }
  0xb2   : > { %1508 = dma.done.wait (%p1993_p11), [#allocation7], 4096   ;;  %p1994_p9 = pmov %p1993_p11 }
  0xb4   : > { %1510 = vsyncadd (%p1994_p9), [#allocation7], 4294963200  ;;  %p1995_p0 = pmov %p1994_p9 }
  0xb6   : > { %1512 = dma.done.wait (%p1995_p0), [#allocation10], 8192   ;;  %p1996_p1 = pmov %p1995_p0 }
  0xb7   : > { %v1552_v0 = vmov 0.0   ;;  %v478_v1 = vld [vmem:[#allocation9 + $0x8] sm:$0xff]  ;;  %v480_v2 = vld [vmem:[#allocation9 + $0x18] sm:$0xff]  ;;  %v477_v3 = vld [vmem:[#allocation9] sm:$0xff]  ;;  %s429_s21 = scalar_lea.vmem [#allocation12], %s1850_s22  ;;  %s1051_s3 = sshll.u32 %s1533_s27, 8 }
  0xb8   : > { %1514 = vsyncadd (%p1996_p1), [#allocation10], 4294959104  ;;  %573 = vmatprep.mubr.f32.mxu0 %v1552_v0  ;;  %v1090_v4 = vpack.c.bf16 %v480_v2, %v478_v1  ;;  %v479_v5 = vld [vmem:[#allocation9 + $0x10] sm:$0xff]  ;;  %v482_v6 = vld [vmem:[#allocation9 + $0x28] sm:$0xff]  ;;  %s872_s2 = sshll.u32 %s429_s21, 4  ;;  %s1997_s17 = sld [smem:[#allocation23_spill]]  ;;  %s1899_s2 = int_to_ptr.vmem [resolvable:$true] %s872_s2 }
  0xb9   : > { %v484_v7 = vld [vmem:[#allocation9 + $0x38] sm:$0xff]  ;;  %v1092_v8 = vpack.c.bf16 %v479_v5, %v477_v3  ;;  %v481_v10 = vld [vmem:[#allocation9 + $0x20] sm:$0xff]  ;;  %v483_v11 = vld [vmem:[#allocation9 + $0x30] sm:$0xff]  ;;  %s859_s0 = scalar_lea.sflag [#allocation5], %s1847_s7  ;;  %s1447_s22 = scalar_lea.vmem %s1899_s2, 256 }
  0xba   : > { %v1094_v9 = vpack.c.bf16 %v484_v7, %v482_v6  ;;  %v486_v12 = vld [vmem:[#allocation9 + $0x48] sm:$0xff]  ;;  %1091 = vmatprep.subr.bf16.mxu0 %v1090_v4  ;;  %v488_v13 = vld [vmem:[#allocation9 + $0x58] sm:$0xff]  ;;  %v1096_v14 = vpack.c.bf16 %v483_v11, %v481_v10  ;;  %v485_v16 = vld [vmem:[#allocation9 + $0x40] sm:$0xff]  ;;  %p1448_p4 = scmp.ne.s32.totalorder %s1899_s2, %s1447_s22  ;;  %s1553_s27 = smov [#allocation12]  }
  0xbb   : > { %1093 = vmatpush1.bf16.msra.mxu0 %v1092_v8  ;;  %v1098_v15 = vpack.c.bf16 %v488_v13, %v486_v12  ;;  %v487_v17 = vld [vmem:[#allocation9 + $0x50] sm:$0xff]  ;;  %v490_v18 = vld [vmem:[#allocation9 + $0x68] sm:$0xff]  ;;  %v492_v19 = vld [vmem:[#allocation9 + $0x78] sm:$0xff]  ;;  %s1451_s20 = sshll.u32 %s1553_s27, 4  ;;  %s1452_s20 = int_to_ptr.vmem [resolvable:$false] %s1451_s20 }
  0xbc   : > { %1095 = vmatprep.subr.bf16.mxu0 %v1094_v9  ;;  %v1100_v20 = vpack.c.bf16 %v487_v17, %v485_v16  ;;  %v1102_v21 = vpack.c.bf16 %v492_v19, %v490_v18  ;;  %v489_v22 = vld [vmem:[#allocation9 + $0x60] sm:$0xff]  ;;  %v491_v23 = vld [vmem:[#allocation9 + $0x70] sm:$0xff]  ;;  %v494_v24 = vld [vmem:[#allocation9 + $0x88] sm:$0xff]  ;;  %p1449_p8 = pnand %p1448_p4, %p1746_p10  ;;  %p1454_p13 = scmp.lt.s32.totalorder %s1899_s2, %s1452_s20 }
  0xbd   : > { %v496_v25 = vld [vmem:[#allocation9 + $0x98] sm:$0xff]  ;;  %v1104_v26 = vpack.c.bf16 %v491_v23, %v489_v22  ;;  %v493_v28 = vld [vmem:[#allocation9 + $0x80] sm:$0xff]  ;;  %v495_v29 = vld [vmem:[#allocation9 + $0x90] sm:$0xff] }
  0xbe   : > { %v1106_v27 = vpack.c.bf16 %v496_v25, %v494_v24  ;;  %v498_v30 = vld [vmem:[#allocation9 + $0xa8] sm:$0xff]  ;;  %v500_v31 = vld [vmem:[#allocation9 + $0xb8] sm:$0xff]  ;;  %v1108_v32 = vpack.c.bf16 %v495_v29, %v493_v28  ;;  %v497_v34 = vld [vmem:[#allocation9 + $0xa0] sm:$0xff]  ;;  %s1904_s19 = scalar_lea.hbm %s1997_s17, %s1051_s3  ;;  %p1450_p2 = pneg %p1449_p8 }
  0xbf   : > { %1097 = vmatpush1.bf16.msra.mxu0 %v1096_v14  ;;  %v1110_v33 = vpack.c.bf16 %v500_v31, %v498_v30  ;;  %v499_v35 = vld [vmem:[#allocation9 + $0xb0] sm:$0xff]  ;;  %v502_v36 = vld [vmem:[#allocation9 + $0xc8] sm:$0xff]  ;;  %v504_v37 = vld [vmem:[#allocation9 + $0xd8] sm:$0xff] }
  0xc0   : > { %1099 = vmatprep.subr.bf16.mxu0 %v1098_v15  ;;  %v1112_v38 = vpack.c.bf16 %v499_v35, %v497_v34  ;;  %v1114_v39 = vpack.c.bf16 %v504_v37, %v502_v36  ;;  %v501_v40 = vld [vmem:[#allocation9 + $0xc0] sm:$0xff]  ;;  %v503_v41 = vld [vmem:[#allocation9 + $0xd0] sm:$0xff]  ;;  %v506_v42 = vld [vmem:[#allocation9 + $0xe8] sm:$0xff] }
  0xc1   : > { %v508_v43 = vld [vmem:[#allocation9 + $0xf8] sm:$0xff]  ;;  %v731_v44 = vld [vmem:[#allocation11 + $0x80] sm:$0xff]  ;;  %v732_v45 = vld [vmem:[#allocation11 + $0x88] sm:$0xff]  ;;  %v1116_v48 = vpack.c.bf16 %v503_v41, %v501_v40 }
  0xc2   : > { %v715_v46 = vld [vmem:[#allocation11] sm:$0xff]  ;;  %v716_v47 = vld [vmem:[#allocation11 + $0x8] sm:$0xff]  ;;  %v1154_v49 = vpack.c.bf16 %v732_v45, %v731_v44  ;;  %v1118_v51 = vpack.c.bf16 %v508_v43, %v506_v42  ;;  %v507_v53 = vld [vmem:[#allocation9 + $0xf0] sm:$0xff] }
  0xc3   : > { %1101 = vmatpush1.bf16.msra.mxu0 %v1100_v20  ;;  %v1156_v50 = vpack.c.bf16 %v716_v47, %v715_v46  ;;  %v505_v52 = vld [vmem:[#allocation9 + $0xe0] sm:$0xff]  ;;  %v444_v54 = vld [vmem:[#allocation8 + $0x8] sm:$0xff]  ;;  %v446_v55 = vld [vmem:[#allocation8 + $0x18] sm:$0xff] }
  0xc4   : > { %1103 = vmatprep.subr.bf16.mxu0 %v1102_v21  ;;  %1155 = vmatprep.subr.bf16.mxu1 %v1154_v49  ;;  %v1120_v56 = vpack.c.bf16 %v507_v53, %v505_v52  ;;  %v1122_v57 = vpack.c.bf16 %v446_v55, %v444_v54  ;;  %v443_v58 = vld [vmem:[#allocation8] sm:$0xff]  ;;  %v445_v59 = vld [vmem:[#allocation8 + $0x10] sm:$0xff]  ;;  %v448_v60 = vld [vmem:[#allocation8 + $0x28] sm:$0xff] }
  0xc5   : > { %1157 = vmatpush3.bf16.msra.mxu1 %v1156_v50  ;;  %v450_v61 = vld [vmem:[#allocation8 + $0x38] sm:$0xff]  ;;  %v475_v62 = vld [vmem:[%s378_s12] sm:$0xff]  ;;  %v1124_v63 = vpack.c.bf16 %v445_v59, %v443_v58  ;;  %v452_v4 = vld [vmem:[#allocation8 + $0x48] sm:$0xff] }
  0xc6   : > { %v1126_v1 = vpack.c.bf16 %v450_v61, %v448_v60  ;;  %v447_v2 = vld [vmem:[#allocation8 + $0x20] sm:$0xff]  ;;  %v449_v3 = vld [vmem:[#allocation8 + $0x30] sm:$0xff]  ;;  %v454_v5 = vld [vmem:[#allocation8 + $0x58] sm:$0xff] }
  0xc7   : > { %1105 = vmatpush1.bf16.msra.mxu0 %v1104_v26  ;;  %v1128_v6 = vpack.c.bf16 %v449_v3, %v447_v2  ;;  %v476_v7 = vld [vmem:[%s378_s12 + $0x8] sm:$0xff]  ;;  %v1130_v8 = vpack.c.bf16 %v454_v5, %v452_v4  ;;  %v451_v9 = vld [vmem:[#allocation8 + $0x40] sm:$0xff]  ;;  %v453_v10 = vld [vmem:[#allocation8 + $0x50] sm:$0xff] }
  0xc8   : > { %1107 = vmatprep.subr.bf16.mxu0 %v1106_v27  ;;  %v456_v11 = vld [vmem:[#allocation8 + $0x68] sm:$0xff]  ;;  %v458_v12 = vld [vmem:[#allocation8 + $0x78] sm:$0xff]  ;;  %v1132_v13 = vpack.c.bf16 %v453_v10, %v451_v9  ;;  %v455_v15 = vld [vmem:[#allocation8 + $0x60] sm:$0xff] }
  0xc9   : > { %v1134_v14 = vpack.c.bf16 %v458_v12, %v456_v11  ;;  %v457_v16 = vld [vmem:[#allocation8 + $0x70] sm:$0xff]  ;;  %v460_v17 = vld [vmem:[#allocation8 + $0x88] sm:$0xff]  ;;  %v462_v18 = vld [vmem:[#allocation8 + $0x98] sm:$0xff] }
  0xca   : > { %v1136_v19 = vpack.c.bf16 %v457_v16, %v455_v15  ;;  %v1138_v20 = vpack.c.bf16 %v462_v18, %v460_v17  ;;  %v459_v21 = vld [vmem:[#allocation8 + $0x80] sm:$0xff]  ;;  %v461_v22 = vld [vmem:[#allocation8 + $0x90] sm:$0xff]  ;;  %v464_v23 = vld [vmem:[#allocation8 + $0xa8] sm:$0xff] }
  0xcb   : > { %1109 = vmatpush1.bf16.msra.mxu0 %v1108_v32  ;;  %v466_v24 = vld [vmem:[#allocation8 + $0xb8] sm:$0xff]  ;;  %v1140_v25 = vpack.c.bf16 %v461_v22, %v459_v21  ;;  %v463_v27 = vld [vmem:[#allocation8 + $0xa0] sm:$0xff]  ;;  %v465_v28 = vld [vmem:[#allocation8 + $0xb0] sm:$0xff]  ;;  %v665_v22 = vlaneseq }
  0xcc   : > { %1111 = vmatprep.subr.bf16.mxu0 %v1110_v33  ;;  %v1142_v26 = vpack.c.bf16 %v466_v24, %v464_v23  ;;  %v468_v29 = vld [vmem:[#allocation8 + $0xc8] sm:$0xff]  ;;  %v470_v30 = vld [vmem:[#allocation8 + $0xd8] sm:$0xff]  ;;  %v1144_v31 = vpack.c.bf16 %v465_v28, %v463_v27  ;;  %v467_v33 = vld [vmem:[#allocation8 + $0xc0] sm:$0xff] }
  0xcd   : > { %v1146_v32 = vpack.c.bf16 %v470_v30, %v468_v29  ;;  %v469_v34 = vld [vmem:[#allocation8 + $0xd0] sm:$0xff]  ;;  %v472_v35 = vld [vmem:[#allocation8 + $0xe8] sm:$0xff]  ;;  %v474_v36 = vld [vmem:[#allocation8 + $0xf8] sm:$0xff]  ;;  %v666_v23 = vshrl.u32 %v665_v22, 7 }
  0xce   : > { %v1148_v37 = vpack.c.bf16 %v469_v34, %v467_v33  ;;  %v473_v40 = vld [vmem:[#allocation8 + $0xf0] sm:$0xff]  ;;  %v1887_v43 = vld [vmem:[%s369_s14 + $0x8] sm:$0xff]  ;;  %v735_v50 = vld [vmem:[#allocation11 + $0xa0] sm:$0xff] }
  0xcf   : > { %1113 = vmatpush1.bf16.msra.mxu0 %v1112_v38  ;;  %v1150_v38 = vpack.c.bf16 %v474_v36, %v472_v35  ;;  %v1881_v42 = vld [vmem:[%s369_s14] sm:$0xff]  ;;  %v734_v45 = vld [vmem:[#allocation11 + $0x98] sm:$0xff]  ;;  %v720_v54 = vld [vmem:[#allocation11 + $0x28] sm:$0xff]  ;;  %v667_v24 = vsub.s32 0, %v666_v23  ;;  %s1453_s14 = scalar_lea.vmem %s1452_s20, 512 }
  0xd0   : > { %1115 = vmatprep.subr.bf16.mxu0 %v1114_v39  ;;  %v471_v39 = vld [vmem:[#allocation8 + $0xe0] sm:$0xff]  ;;  %v733_v44 = vld [vmem:[#allocation11 + $0x90] sm:$0xff]  ;;  %v722_v59 = vld [vmem:[#allocation11 + $0x38] sm:$0xff]  ;;  %p1455_p3 = scmp.lt.s32.totalorder %s1453_s14, %s1447_s22 }
  0xd1   : > { %v1152_v41 = vpack.c.bf16 %v473_v40, %v471_v39  ;;  %v1158_v46 = vpack.c.bf16 %v734_v45, %v733_v44  ;;  %v717_v47 = vld [vmem:[#allocation11 + $0x10] sm:$0xff]  ;;  %v719_v53 = vld [vmem:[#allocation11 + $0x20] sm:$0xff]  ;;  %v724_v2 = vld [vmem:[#allocation11 + $0x48] sm:$0xff] }
  0xd2   : > { %v1164_v55 = vpack.c.bf16 %v720_v54, %v719_v53  ;;  %v721_v58 = vld [vmem:[#allocation11 + $0x30] sm:$0xff]  ;;  %v739_v61 = vld [vmem:[#allocation11 + $0xc0] sm:$0xff]  ;;  %v742_v4 = vld [vmem:[#allocation11 + $0xd8] sm:$0xff]  ;;  %p1456_p5 = por %p1455_p3, %p1454_p13 }
  0xd3   : > { %1117 = vmatpush1.bf16.msra.mxu0 %v1116_v48  ;;  %v718_v48 = vld [vmem:[#allocation11 + $0x18] sm:$0xff]  ;;  %1159 = vmatprep.subr.bf16.mxu1 %v1158_v46  ;;  %v1168_v60 = vpack.c.bf16 %v722_v59, %v721_v58  ;;  %v741_v3 = vld [vmem:[#allocation11 + $0xd0] sm:$0xff]  ;;  %v743_v9 = vld [vmem:[#allocation11 + $0xe0] sm:$0xff] }
  0xd4   : > { %1119 = vmatprep.subr.bf16.mxu0 %v1118_v51  ;;  %v1160_v49 = vpack.c.bf16 %v718_v48, %v717_v47  ;;  %v736_v51 = vld [vmem:[#allocation11 + $0xa8] sm:$0xff]  ;;  %v745_v15 = vld [vmem:[#allocation11 + $0xf0] sm:$0xff]  ;;  %v746_v16 = vld [vmem:[#allocation11 + $0xf8] sm:$0xff]  ;;  %p1457_p7 = pnand %p1456_p5, %p1450_p2 }
  0xd5   : > { %v1162_v52 = vpack.c.bf16 %v736_v51, %v735_v50  ;;  %v744_v10 = vld [vmem:[#allocation11 + $0xe8] sm:$0xff]  ;;  %v1182_v18 = vpack.c.bf16 %v746_v16, %v745_v15 }
  0xd6   : > { %1161 = vmatpush3.bf16.msra.mxu1 %v1160_v49  ;;  %v1178_v12 = vpack.c.bf16 %v744_v10, %v743_v9 }
  0xd7   : > { %1121 = vmatpush1.bf16.msra.mxu0 %v1120_v56  ;;  %1163 = vmatprep.subr.bf16.mxu1 %v1162_v52  ;;  %v738_v56 = vld [vmem:[#allocation11 + $0xb8] sm:$0xff] }
  0xd8   : > { %1123 = vmatprep.subr.bf16.mxu0 %v1122_v57 }
  0xda   : > { %574 = vmatmul.mubr.f32.vlgmr.msra.gmra.mrb[0].mxu0 %v475_v62  ;;  %1165 = vmatpush3.bf16.msra.mxu1 %v1164_v55  ;;  %v740_v62 = vld [vmem:[#allocation11 + $0xc8] sm:$0xff] }
  0xdb   : > { %1125 = vmatpush1.bf16.msra.mxu0 %v1124_v63  ;;  %579 = vmatprep.mubr.f32.mxu0 %v1552_v0  ;;  %v723_v63 = vld [vmem:[#allocation11 + $0x40] sm:$0xff] }
  0xdc   : > { %1127 = vmatprep.subr.bf16.mxu0 %v1126_v1  ;;  %v1170_v1 = vpack.c.bf16 %v740_v62, %v739_v61  ;;  %v1172_v5 = vpack.c.bf16 %v724_v2, %v723_v63 }
  0xde   : > { %580 = vmatmul.mubr.f32.gmra.mrb[2].mxu0 %v476_v7  ;;  %v725_v7 = vld [vmem:[#allocation11 + $0x50] sm:$0xff] }
  0xdf   : > { %1129 = vmatpush1.bf16.msra.mxu0 %v1128_v6  ;;  %650 = vmatprep.mubr.f32.mxu0 %v1552_v0  ;;  %v1174_v6 = vpack.c.bf16 %v742_v4, %v741_v3 }
  0xe0   : > { %1131 = vmatprep.subr.bf16.mxu0 %v1130_v8  ;;  %v726_v8 = vld [vmem:[#allocation11 + $0x58] sm:$0xff] }
  0xe1   : > { %v1176_v11 = vpack.c.bf16 %v726_v8, %v725_v7 }
  0xe3   : > { %1133 = vmatpush1.bf16.msra.mxu0 %v1132_v13  ;;  %v727_v13 = vld [vmem:[#allocation11 + $0x60] sm:$0xff] }
  0xe4   : > { %1135 = vmatprep.subr.bf16.mxu0 %v1134_v14  ;;  %v728_v14 = vld [vmem:[#allocation11 + $0x68] sm:$0xff] }
  0xe5   : > { %v1180_v17 = vpack.c.bf16 %v728_v14, %v727_v13  ;;  %v1043_v13 = vld [vmem:[%s1960_s6] ss:$0 sm:$0xff] }
  0xe7   : > { %1137 = vmatpush1.bf16.msra.mxu0 %v1136_v19  ;;  %v729_v19 = vld [vmem:[#allocation11 + $0x70] sm:$0xff] }
  0xe8   : > { %1139 = vmatprep.subr.bf16.mxu0 %v1138_v20  ;;  %v730_v20 = vld [vmem:[#allocation11 + $0x78] sm:$0xff] }
  0xe9   : > { %v1184_v21 = vpack.c.bf16 %v730_v20, %v729_v19 }
  0xeb   : > { %1141 = vmatpush1.bf16.msra.mxu0 %v1140_v25  ;;  %v663_v25 = vld [vmem:[%s1958_s4] sm:$0x3] }
  0xec   : > { %1143 = vmatprep.subr.bf16.mxu0 %v1142_v26  ;;  %v671_v26 = vsub.s32 1, %v666_v23  ;;  %v668_v27 = vrot.slane %v663_v25, %v667_v24 }
  0xee   : > { %v672_v28 = vrot.slane %v663_v25, %v671_v26 }
  0xef   : > { %1145 = vmatpush1.bf16.msra.mxu0 %v1144_v31 }
  0xf0   : > { %1147 = vmatprep.subr.bf16.mxu0 %v1146_v32 }
  0xf3   : > { %1149 = vmatpush1.bf16.msra.mxu0 %v1148_v37 }
  0xf4   : > { %1151 = vmatprep.subr.bf16.mxu0 %v1150_v38 }
  0xf7   : > { %1153 = vmatpush1.bf16.msra.mxu0 %v1152_v41 }
  0xfa   : > { %651 = vmatmul.mubr.f32.vlgmr.msra.gmra.mrb[0].mxu0 %v1881_v42 }
  0xfb   : > { %656 = vmatprep.mubr.f32.mxu0 %v1552_v0  ;;  %v737_v0 = vld [vmem:[#allocation11 + $0xb0] sm:$0xff] }
  0xfc   : > { %v1166_v57 = vpack.c.bf16 %v738_v56, %v737_v0 }
  0xfe   : > { %657 = vmatmul.mubr.f32.gmra.mrb[2].mxu0 %v1887_v43  ;;  %1167 = vmatprep.subr.bf16.mxu1 %v1166_v57 }
  0xff   : > { %1169 = vmatpush3.bf16.msra.mxu1 %v1168_v60 }
 0x100   : > { %1171 = vmatprep.subr.bf16.mxu1 %v1170_v1 }
 0x103   : > { %1173 = vmatpush3.bf16.msra.mxu1 %v1172_v5 }
 0x104   : > { %1175 = vmatprep.subr.bf16.mxu1 %v1174_v6 }
 0x107   : > { %1177 = vmatpush3.bf16.msra.mxu1 %v1176_v11 }
 0x108   : > { %1179 = vmatprep.subr.bf16.mxu1 %v1178_v12 }
 0x10b   : > { %1181 = vmatpush3.bf16.msra.mxu1 %v1180_v17 }
 0x10c   : > { %1183 = vmatprep.subr.bf16.mxu1 %v1182_v18 }
 0x10f   : > { %1185 = vmatpush3.bf16.msra.mxu1 %v1184_v21 }
 0x1cd   : > { %v652_v29 = vpop.f32.mrb[0].mxu0 }
 0x1ce   : > { %v675_v30 = vadd.f32 %v668_v27, %v652_v29  ;;  %v654_v31 = vpop.f32.mrb[1].mxu0 }
 0x1cf   : > { %v676_v32 = vadd.f32 %v672_v28, %v654_v31 }
 0x1d0   : > { %v683_v33 = vmul.f32 0.044715, %v675_v30  ;;  %v679_v63 = vmul.f32 0.5, %v675_v30 }
 0x1d1   : > { %v658_v34 = vpop.f32.mrb[2].mxu0  ;;  %v684_v35 = vmul.f32 0.044715, %v676_v32  ;;  %v680_v61 = vmul.f32 0.5, %v676_v32 }
 0x1d2   : > { %v687_v36 = vmul.f32 %v683_v33, %v675_v30  ;;  %v677_v37 = vadd.f32 %v668_v27, %v658_v34  ;;  %v660_v38 = vpop.f32.mrb[3].mxu0 }
 0x1d3   : > { %v678_v39 = vadd.f32 %v672_v28, %v660_v38  ;;  %v688_v40 = vmul.f32 %v684_v35, %v676_v32 }
 0x1d4   : > { %v685_v41 = vmul.f32 0.044715, %v677_v37  ;;  %v691_v44 = vmul.f32 %v687_v36, %v675_v30  ;;  %v681_v8 = vmul.f32 0.5, %v677_v37 }
 0x1d5   : > { %v686_v45 = vmul.f32 0.044715, %v678_v39  ;;  %v692_v46 = vmul.f32 %v688_v40, %v676_v32  ;;  %v682_v6 = vmul.f32 0.5, %v678_v39 }
 0x1d6   : > { %v689_v47 = vmul.f32 %v685_v41, %v677_v37  ;;  %v695_v48 = vadd.f32 %v691_v44, %v675_v30 }
 0x1d7   : > { %v690_v49 = vmul.f32 %v686_v45, %v678_v39  ;;  %v696_v50 = vadd.f32 %v692_v46, %v676_v32 }
 0x1d8   : > { %v699_v51 = vmul.f32 0.7978846, %v695_v48  ;;  %v693_v52 = vmul.f32 %v689_v47, %v677_v37 }
 0x1d9   : > { %v700_v53 = vmul.f32 0.7978846, %v696_v50  ;;  %v694_v54 = vmul.f32 %v690_v49, %v678_v39 }
 0x1da   : > { %1295 = vtanh.f32 %v699_v51  ;;  %v697_v55 = vadd.f32 %v693_v52, %v677_v37 }
 0x1db   : > { %1297 = vtanh.f32 %v700_v53  ;;  %v698_v0 = vadd.f32 %v694_v54, %v678_v39 }
 0x1dc   : > { %v701_v56 = vmul.f32 0.7978846, %v697_v55 }
 0x1dd   : > { %v702_v57 = vmul.f32 0.7978846, %v698_v0 }
 0x1de   : > { %1299 = vtanh.f32 %v701_v56 }
 0x1df   : > { %1301 = vtanh.f32 %v702_v57 }
 0x1e4   : > { %v1296_v58 = vpop.eup %1295 }
 0x1e5   : > { %v1298_v59 = vpop.eup %1297  ;;  %v707_v60 = vadd.f32 1.0, %v1296_v58 }
 0x1e6   : > { %v708_v62 = vadd.f32 1.0, %v1298_v59 }
 0x1e7   : > { %v711_v4 = vmul.f32 %v707_v60, %v679_v63 }
 0x1e8   : > { %v1300_v1 = vpop.eup %1299  ;;  %v712_v2 = vmul.f32 %v708_v62, %v680_v61 }
 0x1e9   : > { %v1302_v3 = vpop.eup %1301  ;;  %v709_v5 = vadd.f32 1.0, %v1300_v1 }
 0x1ea   : > { %811 = vmatprep.mubr.f32.mxu1 %v712_v2  ;;  %v710_v7 = vadd.f32 1.0, %v1302_v3 }
 0x1eb   : > { %812 = vmatmul.mubr.f32.vlgmr.msra.gmra.mrb[0].mxu1 %v711_v4  ;;  %v713_v10 = vmul.f32 %v709_v5, %v681_v8 }
 0x1ec   : > { %v714_v9 = vmul.f32 %v710_v7, %v682_v6 }
 0x1ee   : > { %816 = vmatprep.mubr.f32.mxu1 %v714_v9 }
 0x1ef   : > { %817 = vmatmul.mubr.f32.gmra.mrb[2].mxu1 %v713_v10 }
 0x2be   : > { %v1084_v11 = vpop.f32.mrb[0].mxu1 }
 0x2bf   : > { %v1085_v12 = vpop.f32.mrb[1].mxu1 }
 0x2c0   : > { %v1086_v14 = vadd.f32 %v1085_v12, %v1084_v11 }
 0x2c2   : > { %v850_v15 = vadd.f32 %v1086_v14, %v1043_v13  ;;  %v1087_v16 = vpop.f32.mrb[2].mxu1 }
 0x2c3   : > { %v1088_v17 = vpop.f32.mrb[3].mxu1 }
 0x2c4   : > { %v854_v18 = vadd.f32 %v850_v15, %v1881_v42  ;;  %v1089_v19 = vadd.f32 %v1088_v17, %v1087_v16 }
 0x2c6   : > { %856 = vst [vmem:[%s429_s21] sm:$0xff] %v854_v18  ;;  %v851_v20 = vadd.f32 %v1089_v19, %v1043_v13 }
 0x2c8   : > { %v855_v21 = vadd.f32 %v851_v20, %v1887_v43 }
 0x2ca   : > { %857 = vst [vmem:[%s429_s21 + $0x8] sm:$0xff] %v855_v21 }
 0x2cb   : > { %1460 = shalt.err (!%p1457_p7)
}
 0x2cc   : > { %s1461_s11 = scalar_lea.hbm %s1904_s19, 256  ;;  %s1465_s30 = scalar_lea.hbm %s1997_s17, 512 }
 0x2cd   : > { %p1462_p12 = scmp.ne.s32.totalorder %s1904_s19, %s1461_s11  ;;  %p1466_p9 = scmp.lt.u32.totalorder %s1904_s19, %s1997_s17 }
 0x2ce   : > { %p1467_p0 = scmp.lt.u32.totalorder %s1465_s30, %s1461_s11  ;;  %p1469_p4 = scmp.lt.u32.totalorder %s1461_s11, %s1904_s19 }
 0x2cf   : > { %p1463_p6 = pnand %p1462_p12, %p1746_p10 }
 0x2d0   : > { %p1468_p1 = por %p1467_p0, %p1466_p9 }
 0x2d1   : > { %p1464_p11 = pneg %p1463_p6 }
 0x2d2   : > { %p1470_p8 = por %p1469_p4, %p1468_p1 }
 0x2d4   : > { %p1471_p2 = pnand %p1470_p8, %p1464_p11 }
 0x2d6   : > { %1474 = shalt.err (!%p1471_p2)
}
 0x2d7   : > { %s1554_s13 = smov 128   ;;  %s1555_s21 = smov 8  }
 0x2d8   : > { %1206 = dma.vmem_to_hbm [thread:$0]  (%p1746_p10), %s1899_s2, 256, %s1904_s19, %s859_s0, %s1554_s13, %s1554_s13, %s1555_s21  }
 0x2d9 PF: > { %s1998_s3 = sld [smem:[#allocation18_spill]]  ;;  %s1999_s18 = sld [smem:[#allocation19_spill]] }
 0x2da   : > { %p2001_p3 = scmp.ge.s32.totalorder %s1541_s29, 2 }
 0x2df   : > { %s887_s8 = sand.u32 1, %s1998_s3   ;;  %p2000_p13 = scmp.ne.s32.totalorder %s1999_s18, 0 }
 0x2e0   : > { %s888_s22 = scalar_lea.sflag [#allocation5], %s887_s8 }
 0x2e1   : > { %p1226_p5 = pnand %p2001_p3, %p2000_p13 }
 0x2e3   : > { %1516 = dma.done.wait (!%p1226_p5), %s888_s22, 256  }
 0x2e4   : > { %1518 = vsyncadd (!%p1226_p5), %s888_s22, 4294967040  ;;  %s27_s29 = sadd.s32 1, %s1541_s29   ;;  %s2002_s10 = smov %s2009_s24 }
 0x2e5   : > { %p24_p7 = scmp.ge.s32.totalorder %s27_s29, 4   ;;  %s2003_s24 = smov %s1525_s25 }
 0x2e6   : > { %s2004_s25 = smov %s1529_s26  ;;  %s2005_s26 = smov %s1758_s23 }
 0x2e7   : > { %s2006_s27 = smov %s1537_s28  ;;  %s2007_s28 = smov %s2002_s10 }
 0x2e8   :  { %26 = sbr.rel (!%p24_p7) target bundleno = 14 (0xe), region = 136 }
 0x2ef   :  { %893 = vsyncpa [#allocation4], 1 }
 0x2f0   :  { %895 = vsyncpa [#allocation4 + $0x1], 1 }
 0x2f1   :  { %896 = vsyncpa [#allocation7], 1 }
 0x2f2   :  { %898 = vsyncpa [#allocation7 + $0x1], 1 }
 0x2f3   :  { %899 = vsyncpa [#allocation10], 1 }
 0x2f4   :  { %900 = vsyncpa [#allocation5], 1 }
 0x2f5   :  { %902 = vsyncpa [#allocation5 + $0x1], 1 }

</bundles_post_ra>
